<compile_context>
chip_gen: v6e
topology: v6e:2x2x1
jax: 0.10.0
libtpu: 0.0.40
codegen_flags: <defaults>
</compile_context>

<pallas_src>
import math

import jax
import jax.numpy as jnp
from jax.experimental import pallas as pl
from jax.experimental.pallas import tpu as pltpu


def _leaky(v):
    # nn.LeakyReLU(0.2)
    return jnp.where(v > 0, v, 0.2 * v)


def dgc_kernel(x_ref, adjB_ref, Ws_ref, Wc2T_ref, t1b_ref, Wd_ref, o_ref):
    # Shapes:
    #   x_ref    (B, N, C)      node features
    #   adjB_ref (B*N, B*N)     block-diag of the normalized static adjacency
    #   Ws_ref   (C, C)         static_weight
    #   Wc2T_ref (C, N)         node-feature half of the 1x1 conv weight, pre-transposed
    #   t1b_ref  (B, N)         connect_vec @ Wc1.T + conv bias (precomputed in wrapper)
    #   Wd_ref   (C, F)         dynamic_weight
    #   o_ref    (B*N, F)
    B, N, C = x_ref.shape
    F = Wd_ref.shape[1]

    x_flat = x_ref[...].reshape(B * N, C)                               # (B*N, C)

    # ---- forward_static_gcn:  x1 = x + leaky(adj_s @ x) @ Ws (one flat MXU matmul) ----
    h = _leaky(jnp.dot(adjB_ref[...], x_flat,
                       preferred_element_type=jnp.float32))             # (B*N, C)
    x1_flat = x_flat + jnp.dot(h, Ws_ref[...],
                               preferred_element_type=jnp.float32)      # (B*N, C)

    # ---- forward_construct_dynamic_graph (1x1 conv over [connect_vec ; x1^T]) ----
    # Flat matmul; rows index (b, m), columns index output node j.
    logits = jnp.dot(x1_flat, Wc2T_ref[...],
                     preferred_element_type=jnp.float32)                # (B*N, N)
    # dyn_t[b, m, j] == dyn[b, j, m] (transposed orientation of the reference conv out).
    dyn_t = jax.nn.sigmoid(logits.reshape(B, N, N) + t1b_ref[...][:, None, :])

    # ---- genAdj + gen_adjs folded:  adj2[i,j] = e[i] * dyn[i,j] * e[j]  ----
    # (dyn > 0 from the sigmoid, so all row sums are strictly positive.)
    d1 = 1.0 / jnp.sqrt(jnp.sum(dyn_t, axis=1))                         # d1[b,i] = rsqrt(sum_k dyn[b,i,k])
    s = jnp.sum(dyn_t * d1[:, None, :], axis=2)                         # s[b,i]  = sum_j d1[b,j]*dyn[b,j,i]
    e = d1 / jnp.sqrt(d1 * s)                                           # (B, N), strictly positive
    e_col = e[:, :, None]                                               # (B, N, 1)

    # ---- forward_dynamic_gcn with diagonal scaling (adj2 never materialized):
    #        adj2 @ x1 = E (dyn (E x1)),  and leaky(E z) = E leaky(z) since e > 0.
    u = e_col * x1_flat.reshape(B, N, C)                                # (B, N, C)
    # dyn differs per batch, so this matmul is inherently per-batch (B is tiny/static);
    # dyn_t[b].T restores the reference row/col orientation of dyn.
    h2_pre = jnp.stack([
        jnp.dot(dyn_t[b].T, u[b], preferred_element_type=jnp.float32)
        for b in range(B)
    ])                                                                  # (B, N, C) = dyn @ (E x1)
    h2_flat = (e_col * _leaky(h2_pre)).reshape(B * N, C)                # = leaky(adj2 @ x1)

    o_ref[...] = _leaky(jnp.dot(h2_flat, Wd_ref[...],
                                preferred_element_type=jnp.float32))    # (B*N, F)


def dynamic_graph_conv(x, connect_vec, A, Ws, Wconv, bconv, Wd):
    """x: (B,N,C)  connect_vec: (B,C)  A: (N,N)  Ws: (C,C)
    Wconv: (N, 2C) 1x1-conv weight (kernel dim squeezed)  bconv: (N,)  Wd: (C,F)"""
    B, N, C = x.shape
    F = Wd.shape[1]
    hp = jax.lax.Precision.HIGHEST

    Wc1 = Wconv[:, :C]          # acts on the broadcast connect_vec half
    Wc2T = Wconv[:, C:].T       # node-feature half, pre-transposed to (C, N)

    # gen_adj(A): batch-invariant, hoisted to XLA.  Requires positive row sums of A.
    d = 1.0 / jnp.sqrt(jnp.sum(A, axis=1))
    adj_s = d[:, None] * A.T * d[None, :]                               # (N, N)
    # Block-diagonal lift -> one flat (B*N,B*N)@(B*N,C) MXU matmul in-kernel.
    # For large B switch to a batch grid (parallel) and pass adj_s as (N, N) instead.
    adjB = jnp.kron(jnp.eye(B, dtype=adj_s.dtype), adj_s)               # (B*N, B*N)

    # Degenerate 1-wide half of the 1x1 conv (connect_vec part + bias), hoisted to XLA.
    t1b = jnp.matmul(connect_vec, Wc1.T, precision=hp) + bconv[None, :]  # (B, N)

    vmem = pl.BlockSpec(memory_space=pltpu.MemorySpace.VMEM)
    out_flat = pl.pallas_call(
        dgc_kernel,
        out_shape=jax.ShapeDtypeStruct((B * N, F), jnp.float32),
        in_specs=[vmem, vmem, vmem, vmem, vmem, vmem],
        out_specs=vmem,
    )(x, adjB, Ws, Wc2T, t1b, Wd)
    return out_flat.reshape(B, N, F)


def reference(x, cv, A, Ws, Wconv, bconv, Wd):
    # Pure-JAX mirror of the PyTorch forward (verification only), full f32 precision.
    hp = jax.lax.Precision.HIGHEST

    def norm(M):
        dd = jnp.power(jnp.sum(M, axis=-1), -0.5)
        return dd[..., :, None] * jnp.swapaxes(M, -1, -2) * dd[..., None, :]

    adj_s = norm(A)
    out_static = jnp.einsum("nk,bkc->bnc", adj_s, x, precision=hp)
    out_static = jnp.einsum("bnc,cd->bnd", _leaky(out_static), Ws, precision=hp)
    x1 = x + out_static
    xt = jnp.swapaxes(x1, 1, 2)                                         # (B, C, N)
    cvb = jnp.broadcast_to(cv[:, :, None], (x.shape[0], cv.shape[1], x.shape[1]))
    cat = jnp.concatenate([cvb, xt], axis=1)                            # (B, 2C, N)
    dyn = jax.nn.sigmoid(jnp.einsum("nc,bcm->bnm", Wconv, cat, precision=hp)
                         + bconv[None, :, None])
    adj2 = norm(norm(dyn))                                              # genAdj + gen_adjs
    h = _leaky(jnp.einsum("bnm,bmc->bnc", adj2, x1, precision=hp))
    return _leaky(jnp.einsum("bnc,cf->bnf", h, Wd, precision=hp))


if __name__ == "__main__":
    B, N, C, F = 2, 8, 32, 32   # batch, num_nodes, in_features, out_features
    key = jax.random.PRNGKey(0)
    ks = jax.random.split(key, 7)

    x = jax.random.normal(ks[0], (B, N, C), jnp.float32)
    connect_vec = jax.random.normal(ks[1], (B, C), jnp.float32)

    # CustomMatrix(adjList): positive adjacency so rowsum^-0.5 is finite.
    A = jax.random.uniform(ks[2], (N, N), jnp.float32, minval=0.1, maxval=1.0)

    s_stdv = 1.0 / math.sqrt(C)       # static_weight: (in, in), U(-1/sqrt(in), ...)
    Ws = jax.random.uniform(ks[3], (C, C), jnp.float32, minval=-s_stdv, maxval=s_stdv)
    d_stdv = 1.0 / math.sqrt(F)       # dynamic_weight: (in, out), U(-1/sqrt(out), ...)
    Wd = jax.random.uniform(ks[4], (C, F), jnp.float32, minval=-d_stdv, maxval=d_stdv)
    c_stdv = 1.0 / math.sqrt(2 * C)   # Conv1d(in=2C, out=N, k=1) default-ish init
    Wconv = jax.random.uniform(ks[5], (N, 2 * C), jnp.float32, minval=-c_stdv, maxval=c_stdv)
    bconv = jax.random.uniform(ks[6], (N,), jnp.float32, minval=-c_stdv, maxval=c_stdv)

    out = dynamic_graph_conv(x, connect_vec, A, Ws, Wconv, bconv, Wd)
    out = jax.block_until_ready(out)

    ref = reference(x, connect_vec, A, Ws, Wconv, bconv, Wd)
    assert out.shape == (B, N, F)
    assert jnp.allclose(out, ref, atol=1e-3, rtol=1e-3), "mismatch vs JAX reference"
    print("KERNEL_OK")
</pallas_src>

<mosaic_0001>
module attributes {stable_mosaic.version = 11 : i64} {
  func.func @dgc_kernel(%arg0: memref<2x8x32xf32, #tpu.memory_space<vmem>>, %arg1: memref<16x16xf32, #tpu.memory_space<vmem>>, %arg2: memref<32x32xf32, #tpu.memory_space<vmem>>, %arg3: memref<32x8xf32, #tpu.memory_space<vmem>>, %arg4: memref<2x8xf32, #tpu.memory_space<vmem>>, %arg5: memref<32x32xf32, #tpu.memory_space<vmem>>, %arg6: memref<16x32xf32, #tpu.memory_space<vmem>>) attributes {dimension_semantics = [], scalar_prefetch = 0 : i64, scratch_operands = 0 : i64, tpu.core_type = #tpu.core_type<tc>} {
    %c0 = arith.constant 0 : index
    %c0_0 = arith.constant 0 : index
    %c0_1 = arith.constant 0 : index
    %0 = vector.load %arg0[%c0, %c0_0, %c0_1] : memref<2x8x32xf32, #tpu.memory_space<vmem>>, vector<2x8x32xf32>
    %1 = vector.shape_cast %0 : vector<2x8x32xf32> to vector<16x32xf32>
    %c0_2 = arith.constant 0 : index
    %c0_3 = arith.constant 0 : index
    %2 = vector.load %arg1[%c0_2, %c0_3] : memref<16x16xf32, #tpu.memory_space<vmem>>, vector<16x16xf32>
    %cst = arith.constant dense<0.000000e+00> : vector<16x32xf32>
    %3 = tpu.matmul %2, %1, %cst {dimension_numbers = #tpu.dot_dimension_numbers<[1], [0], [0], [1], [0, 0, 1, 1], [], []>} : vector<16x16xf32>, vector<16x32xf32>, vector<16x32xf32> -> vector<16x32xf32>
    %cst_4 = arith.constant 0.000000e+00 : f32
    %4 = vector.broadcast %cst_4 : f32 to vector<16x32xf32>
    %5 = arith.cmpf ogt, %3, %4 : vector<16x32xf32>
    %cst_5 = arith.constant 2.000000e-01 : f32
    %6 = vector.broadcast %cst_5 : f32 to vector<16x32xf32>
    %7 = arith.mulf %6, %3 : vector<16x32xf32>
    %8 = arith.select %5, %3, %7 : vector<16x32xi1>, vector<16x32xf32>
    %c0_6 = arith.constant 0 : index
    %c0_7 = arith.constant 0 : index
    %9 = vector.load %arg2[%c0_6, %c0_7] : memref<32x32xf32, #tpu.memory_space<vmem>>, vector<32x32xf32>
    %cst_8 = arith.constant dense<0.000000e+00> : vector<16x32xf32>
    %10 = tpu.matmul %8, %9, %cst_8 {dimension_numbers = #tpu.dot_dimension_numbers<[1], [0], [0], [1], [0, 0, 1, 1], [], []>} : vector<16x32xf32>, vector<32x32xf32>, vector<16x32xf32> -> vector<16x32xf32>
    %11 = arith.addf %1, %10 : vector<16x32xf32>
    %c0_9 = arith.constant 0 : index
    %c0_10 = arith.constant 0 : index
    %12 = vector.load %arg3[%c0_9, %c0_10] : memref<32x8xf32, #tpu.memory_space<vmem>>, vector<32x8xf32>
    %cst_11 = arith.constant dense<0.000000e+00> : vector<16x8xf32>
    %13 = tpu.matmul %11, %12, %cst_11 {dimension_numbers = #tpu.dot_dimension_numbers<[1], [0], [0], [1], [0, 0, 1, 1], [], []>} : vector<16x32xf32>, vector<32x8xf32>, vector<16x8xf32> -> vector<16x8xf32>
    %14 = vector.shape_cast %13 : vector<16x8xf32> to vector<2x8x8xf32>
    %c0_12 = arith.constant 0 : index
    %c0_13 = arith.constant 0 : index
    %15 = vector.load %arg4[%c0_12, %c0_13] : memref<2x8xf32, #tpu.memory_space<vmem>>, vector<2x8xf32>
    %16 = vector.shape_cast %15 : vector<2x8xf32> to vector<2x1x8xf32>
    %17 = vector.broadcast %16 : vector<2x1x8xf32> to vector<2x8x8xf32>
    %18 = arith.addf %14, %17 : vector<2x8x8xf32>
    %19 = arith.negf %18 : vector<2x8x8xf32>
    %20 = math.exp %19 : vector<2x8x8xf32>
    %cst_14 = arith.constant 1.000000e+00 : f32
    %21 = vector.broadcast %cst_14 : f32 to vector<2x8x8xf32>
    %22 = arith.addf %21, %20 : vector<2x8x8xf32>
    %23 = arith.divf %21, %22 : vector<2x8x8xf32>
    %cst_15 = arith.constant dense<0.000000e+00> : vector<2x8xf32>
    %24 = vector.multi_reduction <add>, %23, %cst_15 [1] : vector<2x8x8xf32> to vector<2x8xf32>
    %25 = math.sqrt %24 : vector<2x8xf32>
    %cst_16 = arith.constant 1.000000e+00 : f32
    %26 = vector.broadcast %cst_16 : f32 to vector<2x8xf32>
    %27 = arith.divf %26, %25 : vector<2x8xf32>
    %28 = vector.shape_cast %27 : vector<2x8xf32> to vector<2x1x8xf32>
    %29 = vector.broadcast %28 : vector<2x1x8xf32> to vector<2x8x8xf32>
    %30 = arith.mulf %23, %29 : vector<2x8x8xf32>
    %cst_17 = arith.constant dense<0.000000e+00> : vector<2x8xf32>
    %31 = vector.multi_reduction <add>, %30, %cst_17 [2] : vector<2x8x8xf32> to vector<2x8xf32>
    %32 = arith.mulf %27, %31 : vector<2x8xf32>
    %33 = math.sqrt %32 : vector<2x8xf32>
    %34 = arith.divf %27, %33 : vector<2x8xf32>
    %35 = vector.shape_cast %34 : vector<2x8xf32> to vector<2x8x1xf32>
    %36 = vector.shape_cast %11 : vector<16x32xf32> to vector<2x8x32xf32>
    %37 = vector.broadcast %35 : vector<2x8x1xf32> to vector<2x8x32xf32>
    %38 = arith.mulf %37, %36 : vector<2x8x32xf32>
    %39 = vector.extract_strided_slice %23 {offsets = [0, 0, 0], sizes = [1, 8, 8], strides = [1, 1, 1]} : vector<2x8x8xf32> to vector<1x8x8xf32>
    %40 = vector.shape_cast %39 : vector<1x8x8xf32> to vector<8x8xf32>
    %41 = tpu.transpose %40, [1, 0] : vector<8x8xf32> -> vector<8x8xf32>
    %42 = vector.extract_strided_slice %38 {offsets = [0, 0, 0], sizes = [1, 8, 32], strides = [1, 1, 1]} : vector<2x8x32xf32> to vector<1x8x32xf32>
    %43 = vector.shape_cast %42 : vector<1x8x32xf32> to vector<8x32xf32>
    %cst_18 = arith.constant dense<0.000000e+00> : vector<8x32xf32>
    %44 = tpu.matmul %41, %43, %cst_18 {dimension_numbers = #tpu.dot_dimension_numbers<[1], [0], [0], [1], [0, 0, 1, 1], [], []>} : vector<8x8xf32>, vector<8x32xf32>, vector<8x32xf32> -> vector<8x32xf32>
    %45 = vector.extract_strided_slice %23 {offsets = [1, 0, 0], sizes = [1, 8, 8], strides = [1, 1, 1]} : vector<2x8x8xf32> to vector<1x8x8xf32>
    %46 = vector.shape_cast %45 : vector<1x8x8xf32> to vector<8x8xf32>
    %47 = tpu.transpose %46, [1, 0] : vector<8x8xf32> -> vector<8x8xf32>
    %48 = vector.extract_strided_slice %38 {offsets = [1, 0, 0], sizes = [1, 8, 32], strides = [1, 1, 1]} : vector<2x8x32xf32> to vector<1x8x32xf32>
    %49 = vector.shape_cast %48 : vector<1x8x32xf32> to vector<8x32xf32>
    %cst_19 = arith.constant dense<0.000000e+00> : vector<8x32xf32>
    %50 = tpu.matmul %47, %49, %cst_19 {dimension_numbers = #tpu.dot_dimension_numbers<[1], [0], [0], [1], [0, 0, 1, 1], [], []>} : vector<8x8xf32>, vector<8x32xf32>, vector<8x32xf32> -> vector<8x32xf32>
    %51 = vector.shape_cast %44 : vector<8x32xf32> to vector<1x8x32xf32>
    %52 = vector.shape_cast %50 : vector<8x32xf32> to vector<1x8x32xf32>
    %53 = tpu.concatenate %51, %52 in 0 : vector<1x8x32xf32>, vector<1x8x32xf32> -> vector<2x8x32xf32>
    %cst_20 = arith.constant 0.000000e+00 : f32
    %54 = vector.broadcast %cst_20 : f32 to vector<2x8x32xf32>
    %55 = arith.cmpf ogt, %53, %54 : vector<2x8x32xf32>
    %cst_21 = arith.constant 2.000000e-01 : f32
    %56 = vector.broadcast %cst_21 : f32 to vector<2x8x32xf32>
    %57 = arith.mulf %56, %53 : vector<2x8x32xf32>
    %58 = arith.select %55, %53, %57 : vector<2x8x32xi1>, vector<2x8x32xf32>
    %59 = vector.broadcast %35 : vector<2x8x1xf32> to vector<2x8x32xf32>
    %60 = arith.mulf %59, %58 : vector<2x8x32xf32>
    %61 = vector.shape_cast %60 : vector<2x8x32xf32> to vector<16x32xf32>
    %c0_22 = arith.constant 0 : index
    %c0_23 = arith.constant 0 : index
    %62 = vector.load %arg5[%c0_22, %c0_23] : memref<32x32xf32, #tpu.memory_space<vmem>>, vector<32x32xf32>
    %cst_24 = arith.constant dense<0.000000e+00> : vector<16x32xf32>
    %63 = tpu.matmul %61, %62, %cst_24 {dimension_numbers = #tpu.dot_dimension_numbers<[1], [0], [0], [1], [0, 0, 1, 1], [], []>} : vector<16x32xf32>, vector<32x32xf32>, vector<16x32xf32> -> vector<16x32xf32>
    %cst_25 = arith.constant 0.000000e+00 : f32
    %64 = vector.broadcast %cst_25 : f32 to vector<16x32xf32>
    %65 = arith.cmpf ogt, %63, %64 : vector<16x32xf32>
    %cst_26 = arith.constant 2.000000e-01 : f32
    %66 = vector.broadcast %cst_26 : f32 to vector<16x32xf32>
    %67 = arith.mulf %66, %63 : vector<16x32xf32>
    %68 = arith.select %65, %63, %67 : vector<16x32xi1>, vector<16x32xf32>
    %c0_27 = arith.constant 0 : index
    %c0_28 = arith.constant 0 : index
    %69 = vector.load %arg6[%c0_27, %c0_28] : memref<16x32xf32, #tpu.memory_space<vmem>>, vector<16x32xf32>
    tpu.vector_store %arg6[%c0_27, %c0_28], %68 {strides = array<i32>} : memref<16x32xf32, #tpu.memory_space<vmem>>, vector<16x32xf32>,
    return
  }
}

</mosaic_0001>

<bundles_post_ra>
// kernel: tpu_custom_call.1
= control target key start
LH: loop header
LB: loop body
LE: loop exit
PB: predicated region body
PF: predicated region fallthrough
CT: control target
= control target key end

     0   :  { %11 = vsyncpa [#allocation3], 0  ;;  %s1141_s0 = inlined_call_operand.hbm [shape: f32[2,8,32], index: 0, kind: input, shape index: {}]   ;;  %s1142_s1 = inlined_call_operand.hbm [shape: f32[16,16], index: 1, kind: input, shape index: {}]   ;;  %s1143_s2 = inlined_call_operand.vmem [shape: f32[32,32], index: 2, kind: input, shape index: {}]   ;;  %s1144_s3 = inlined_call_operand.vmem [shape: f32[32,8], index: 3, kind: input, shape index: {}]   ;;  %s1145_s4 = inlined_call_operand.vmem [shape: f32[2,8], index: 4, kind: input, shape index: {}]   ;;  %s1146_s5 = inlined_call_operand.hbm [shape: f32[32,32], index: 5, kind: input, shape index: {}]   ;;  %s1147_s6 = inlined_call_operand.hbm [shape: f32[16,32], index: 6, kind: output, shape index: {}]  }
   0x1   :  { %12 = vsyncpa [#allocation6], 0 }
   0x2   :  { %13 = vsyncpa [#allocation4], 0  ;;  %s1006_s21 = smov [#allocation5]   ;;  %s1007_s23 = smov [#allocation2]  }
   0x3   :  { %s31_s22 = sshll.u32 %s1006_s21, 4  ;;  %s19_s24 = sshll.u32 %s1007_s23, 4  ;;  %s32_s22 = int_to_ptr.vmem [resolvable:$true] %s31_s22  ;;  %s20_s24 = int_to_ptr.vmem [resolvable:$true] %s19_s24 }
   0x4   :  { %s928_s25 = scalar_lea.vmem %s32_s22, 256  ;;  %p933_p1 = scmp.lt.s32.totalorder %s32_s22, %s32_s22 }
   0x5   :  { %p929_p0 = scmp.ne.s32.totalorder %s32_s22, %s928_s25  ;;  %p934_p2 = scmp.lt.s32.totalorder %s928_s25, %s928_s25 }
   0x7   :  { %p935_p3 = por %p934_p2, %p933_p1 }
   0x9   :  { %p936_p4 = pnand %p935_p3, %p929_p0 }
   0xb   :  { %939 = shalt.err (!%p936_p4)
}
   0xc   :  { %s1008_s26 = smov 128   ;;  %s1009_s27 = smov 8  }
   0xd   :  { %37 = dma.hbm_to_vmem [thread:$0]  %s1142_s1, 256, %s32_s22, [#allocation6], %s1008_s26, %s1008_s26, %s1009_s27  }
   0xe   :  { %s948_s30 = scalar_lea.vmem %s20_s24, 256  ;;  %p953_p6 = scmp.lt.s32.totalorder %s20_s24, %s20_s24 }
   0xf   :  { %p949_p5 = scmp.ne.s32.totalorder %s20_s24, %s948_s30  ;;  %p954_p7 = scmp.lt.s32.totalorder %s948_s30, %s948_s30 }
  0x11   :  { %p955_p8 = por %p954_p7, %p953_p6 }
  0x13   :  { %p956_p9 = pnand %p955_p8, %p949_p5 }
  0x15   :  { %959 = shalt.err (!%p956_p9)
}
  0x16   :  { %25 = dma.hbm_to_vmem [thread:$0]  %s1141_s0, 256, %s20_s24, [#allocation3], %s1008_s26, %s1008_s26, %s1009_s27  }
  0x17   :  { %s1010_s9 = smov [#allocation7]  }
  0x18   :  { %s49_s10 = sshll.u32 %s1010_s9, 4  ;;  %s50_s10 = int_to_ptr.vmem [resolvable:$true] %s49_s10 }
  0x19   :  { %s968_s11 = scalar_lea.vmem %s50_s10, 512  ;;  %p973_p11 = scmp.lt.s32.totalorder %s50_s10, %s50_s10 }
  0x1a   :  { %p969_p10 = scmp.ne.s32.totalorder %s50_s10, %s968_s11  ;;  %p974_p12 = scmp.lt.s32.totalorder %s968_s11, %s968_s11 }
  0x1c   :  { %p975_p13 = por %p974_p12, %p973_p11 }
  0x1e   :  { %p976_p0 = pnand %p975_p13, %p969_p10 }
  0x20   :  { %979 = shalt.err (!%p976_p0)
}
  0x21   :  { %55 = dma.hbm_to_vmem [thread:$0]  %s1146_s5, 512, %s50_s10, [#allocation6], %s1008_s26, %s1008_s26, %s1009_s27  }
  0x22   :  { %1000 = dma.done.wait [#allocation3], 256  }
  0x23   :  { %1001 = vsyncadd [#allocation3], 4294967040 }
  0x24   :  { %1002 = dma.done.wait [#allocation6], 768  }
  0x25   :  { %1003 = vsyncadd [#allocation6], 4294966528  ;;  %vm69_vm0 = vcmask 130048   ;;  %v66_v0 = vld [vmem:[#allocation2 + $0x8] sm:$0xff]  ;;  %v65_v1 = vld [vmem:[#allocation2] sm:$0xff]  ;;  %vm161_vm3 = vcmask 261120   ;;  %v343_v24 = vlaneseq }
  0x26   :  { %v67_v2 = vld [vmem:[#allocation5] sm:$0xff]  ;;  %837 = vmatprep.subr.mxu0 %v66_v0  ;;  %v160_v3 = vld [vmem:[%s1143_s2 + $0x18] sm:$0xff]  ;;  %v158_v6 = vld [vmem:[%s1143_s2 + $0x8] sm:$0xff]  ;;  %v1011_v22 = vmov 1966171168   ;;  %vm378_vm4 = vcmask 64512  }
  0x27   :  { %841 = vmatprep.mubr.msk.f32.mxu0 %vm69_vm0, %v67_v2  ;;  %838 = vmatpush3.msra.mxu0 %v66_v0  ;;  %v68_v4 = vld [vmem:[#allocation5 + $0x8] sm:$0xff]  ;;  %v159_v5 = vld [vmem:[%s1143_s2 + $0x10] sm:$0xff]  ;;  %v157_v7 = vld [vmem:[%s1143_s2] sm:$0xff]  ;;  %v341_v23 = vunpack.c.l.s4 %v1011_v22  ;;  %v1103_v26 = vshrl.u32 %v343_v24, 7  ;;  %vm1013_vm13 = vmmov 0  }
  0x28   :  { %844 = vmatprep.subr.mxu1 %v160_v3  ;;  %839 = vmatprep.subr.mxu0 %v65_v1  ;;  %v248_v8 = vld [vmem:[%s1144_s3 + $0x18] sm:$0xff]  ;;  %v247_v15 = vld [vmem:[%s1144_s3 + $0x10] sm:$0xff]  ;;  %v246_v16 = vld [vmem:[%s1144_s3 + $0x8] sm:$0xff] }
  0x29   :  { %845 = vmatpush3.msra.mxu1 %v160_v3  ;;  %840 = vmatpush3.msra.mxu0 %v65_v1  ;;  %v245_v17 = vld [vmem:[%s1144_s3] sm:$0xff]  ;;  %v342_v25 = vunpack.c.0.s8 %v341_v23  ;;  %v1110_v31 = vsub.s32 0, %v1103_v26 }
  0x2a   :  { %842 = vmatmul.mubr.msk.f32.vlgmr.msra.gmra.mxu0 %vm69_vm0, %v68_v4  ;;  %846 = vmatprep.subr.mxu1 %v159_v5  ;;  %v804_v27 = vld.sshfl [vmem:[%s1145_s4] sm:$0x11 pattern:$0x75316420]  ;;  %s1014_s4 = smov [#allocation8]  }
  0x2b   :  { %847 = vmatpush3.msra.mxu1 %v159_v5  ;;  %855 = vmatprep.subr.mxu0 %v248_v8  ;;  %v339_v28 = vcombine.high %v804_v27, %v804_v27  ;;  %v345_v29 = vsub.s32 %v342_v25, %v1103_v26  ;;  %s785_s29 = sshll.u32 %s1014_s4, 4  ;;  %s786_s29 = int_to_ptr.vmem [resolvable:$true] %s785_s29 }
  0x2c   :  { %848 = vmatprep.subr.mxu1 %v158_v6  ;;  %856 = vmatpush3.msra.mxu0 %v248_v8  ;;  %s980_s30 = scalar_lea.vmem %s786_s29, 256  ;;  %p985_p2 = scmp.lt.s32.totalorder %s786_s29, %s786_s29 }
  0x2d   :  { %849 = vmatpush3.msra.mxu1 %v158_v6  ;;  %857 = vmatprep.subr.mxu0 %v247_v15  ;;  %v353_v30 = vrot.slane %v339_v28, %v345_v29  ;;  %v346_v32 = vrot.slane %v804_v27, %v345_v29  ;;  %p981_p1 = scmp.ne.s32.totalorder %s786_s29, %s980_s30  ;;  %p986_p3 = scmp.lt.s32.totalorder %s980_s30, %s980_s30 }
  0x2e   :  { %850 = vmatprep.subr.mxu1 %v157_v7  ;;  %858 = vmatpush3.msra.mxu0 %v247_v15 }
  0x2f   :  { %851 = vmatpush3.msra.mxu1 %v157_v7  ;;  %859 = vmatprep.subr.mxu0 %v246_v16  ;;  %v361_v33 = vrot.slane %v353_v30, %v1110_v31  ;;  %v357_v34 = vrot.slane %v346_v32, %v1110_v31  ;;  %p987_p4 = por %p986_p3, %p985_p2 }
  0x30   :  { %860 = vmatpush3.msra.mxu0 %v246_v16 }
  0x31   :  { %861 = vmatprep.subr.mxu0 %v245_v17  ;;  %p988_p5 = pnand %p987_p4, %p981_p1 }
  0x32   :  { %862 = vmatpush3.msra.mxu0 %v245_v17 }
  0xea   :  { %v843_v9 = vpop.f32.mrf.mxu0 }
  0xeb   :  { %v154_v10 = vmul.f32 0.2, %v843_v9  ;;  %vm152_vm1 = vcmp.gt.f32.partialorder %v843_v9, 0.0 }
  0xec   :  { %v142_v11 = vpop.f32.mrf.mxu0 }
  0xed   :  { %v153_v12 = vmul.f32 0.2, %v142_v11  ;;  %vm151_vm2 = vcmp.gt.f32.partialorder %v142_v11, 0.0  ;;  %v156_v14 = vsel %vm152_vm1, %v843_v9, %v154_v10 }
  0xef   :  { %v155_v13 = vsel %vm151_vm2, %v142_v11, %v153_v12 }
  0xf0   :  { %852 = vmatprep.mubr.msk.f32.mxu1 %vm161_vm3, %v155_v13  ;;  %v422_v13 = vand.u32 127, %v343_v24 }
  0xf1   :  { %853 = vmatmul.mubr.msk.f32.vlgmr.msra.gmra.mxu1 %vm161_vm3, %v156_v14 }
  0xf2   :  { %v425_v14 = vsub.s32 %v422_v13, %v1103_v26 }
 0x1b1   :  { %v854_v18 = vpop.f32.mrf.mxu1 }
 0x1b2   :  { %v1096_v21 = vadd.f32 %v854_v18, %v66_v0 }
 0x1b3   :  { %v234_v19 = vpop.f32.mrf.mxu1 }
 0x1b4   :  { %v1094_v20 = vadd.f32 %v234_v19, %v65_v1 }
 0x1b6   :  { %863 = vmatprep.mubr.msk.f32.mxu0 %vm161_vm3, %v1094_v20 }
 0x1b7   :  { %864 = vmatmul.mubr.msk.f32.vlgmr.msra.gmra.mxu0 %vm161_vm3, %v1096_v21 }
 0x277   :  { %v865_v35 = vpop.f32.mrf.mxu0 }
 0x278   :  { %v365_v36 = vadd.f32 %v865_v35, %v361_v33 }
 0x279   :  { %v321_v37 = vpop.f32.mrf.mxu0 }
 0x27a   :  { %v806_v38 = vmul.f32 -1.442695, %v365_v36  ;;  %v364_v39 = vadd.f32 %v357_v34, %v321_v37  ;;  %v1012_v34 = vmov 0.0  }
 0x27b   :  { %871 = vmatprep.subr.mxu0 %v1012_v34  ;;  %866 = vmatprep.subr.mxu1 %v1012_v34 }
 0x27c   :  { %896 = vpow2.f32 %v806_v38  ;;  %v805_v40 = vmul.f32 -1.442695, %v364_v39  ;;  %868 = vmatprep.mubr.msk.f32.mxu1 %vm1013_vm13, %v1012_v34  ;;  %873 = vmatprep.mubr.msk.f32.mxu0 %vm1013_vm13, %v1012_v34 }
 0x27e   :  { %898 = vpow2.f32 %v805_v40 }
 0x289   :  { %v897_v41 = vpop.eup %896 }
 0x28a   :  { %v373_v42 = vadd.f32 1.0, %v897_v41 }
 0x28b   :  { %v899_v43 = vpop.eup %898 }
 0x28c   :  { %900 = vrcp.f32 %v373_v42  ;;  %v372_v44 = vadd.f32 1.0, %v899_v43 }
 0x28e   :  { %902 = vrcp.f32 %v372_v44 }
 0x299   :  { %v1114_v45 = vpop.eup %900 }
 0x29a   :  { %v386_v46 = vsel %vm378_vm4, %v1114_v45, 0.0 }
 0x29b   :  { %v903_v47 = vpop.eup %902  ;;  %v387_v48 = vrot.slane %v386_v46, 4 }
 0x29c   :  { %v379_v49 = vsel %vm378_vm4, %v903_v47, 0.0 }
 0x29d   :  { %v380_v50 = vrot.slane %v379_v49, 4  ;;  %v388_v51 = vadd.f32 %v387_v48, %v386_v46  ;;  %v690_v48 = vld [vmem:[#allocation7 + $0x18] sm:$0xff] }
 0x29f   :  { %v381_v52 = vadd.f32 %v380_v50, %v379_v49  ;;  %v389_v53 = vrot.slane %v388_v51, 2 }
 0x2a1   :  { %v382_v54 = vrot.slane %v381_v52, 2  ;;  %v390_v55 = vadd.f32 %v389_v53, %v388_v51 }
 0x2a3   :  { %v383_v56 = vadd.f32 %v382_v54, %v381_v52  ;;  %v391_v57 = vrot.slane %v390_v55, 1 }
 0x2a5   :  { %v384_v58 = vrot.slane %v383_v56, 1  ;;  %v392_v59 = vadd.f32 %v391_v57, %v390_v55 }
 0x2a7   :  { %v385_v60 = vadd.f32 %v384_v58, %v383_v56  ;;  %904 = vrsqrt.f32 %v392_v59  ;;  %vm402_vm5 = vcmp.eq.f32.partialorder %v392_v59, inf  ;;  %v405_v0 = vand.u32 2147483648, %v392_v59 }
 0x2a8   :  { %vm404_vm6 = vcmp.eq.f32.partialorder %v392_v59, 0.0 }
 0x2a9   :  { %906 = vrsqrt.f32 %v385_v60  ;;  %vm395_vm7 = vcmp.eq.f32.partialorder %v385_v60, inf  ;;  %v398_v3 = vand.u32 2147483648, %v385_v60  ;;  %vm397_vm8 = vcmp.eq.f32.partialorder %v385_v60, 0.0 }
 0x2b4   :  { %v905_v61 = vpop.eup %904 }
 0x2b5   :  { %v401_v62 = vmul.f32 %v905_v61, %v392_v59 }
 0x2b6   :  { %v907_v63 = vpop.eup %906 }
 0x2b7   :  { %v394_v1 = vmul.f32 %v907_v63, %v385_v60  ;;  %v403_v2 = vsel %vm402_vm5, %v392_v59, %v401_v62 }
 0x2b8   :  { %v406_v4 = vsel %vm404_vm6, %v405_v0, %v403_v2 }
 0x2b9   :  { %v396_v5 = vsel %vm395_vm7, %v385_v60, %v394_v1  ;;  %908 = vrcp.f32 %v406_v4 }
 0x2ba   :  { %v399_v6 = vsel %vm397_vm8, %v398_v3, %v396_v5 }
 0x2bb   :  { %910 = vrcp.f32 %v399_v6 }
 0x2c6   :  { %v909_v7 = vpop.eup %908 }
 0x2c7   :  { %v412_v11 = vmul.f32 %v909_v7, %v1114_v45 }
 0x2c8   :  { %v911_v8 = vpop.eup %910 }
 0x2c9   :  { %v411_v9 = vmul.f32 %v911_v8, %v903_v47  ;;  %v416_v12 = vsel %vm378_vm4, %v412_v11, 0.0 }
 0x2cb   :  { %v413_v10 = vsel %vm378_vm4, %v411_v9, 0.0 }
 0x2cc   :  { %414 = vadd.xlane.f32.xlu0 %v413_v10 }
 0x2d0   :  { %417 = vadd.xlane.f32.xlu0 %v416_v12 }
 0x2fd   :  { %469 = vxpose.xlu0.b32.start.end [1/1] (short) (narrow) %v903_v47, 8 }
 0x355   :  { %v415_v15 = vpop.xlane.xlu0 %414 }
 0x356   :  { %v426_v16 = vrot.slane %v415_v15, %v425_v14 }
 0x358   :  { %v433_v17 = vmul.f32 %v911_v8, %v426_v16 }
 0x359   :  { %v418_v18 = vpop.xlane.xlu0 %417 }
 0x35a   :  { %912 = vrsqrt.f32 %v433_v17  ;;  %v430_v19 = vrot.slane %v418_v18, %v425_v14  ;;  %vm437_vm9 = vcmp.eq.f32.partialorder %v433_v17, inf  ;;  %v440_v27 = vand.u32 2147483648, %v433_v17 }
 0x35b   :  { %vm439_vm10 = vcmp.eq.f32.partialorder %v433_v17, 0.0 }
 0x35c   :  { %v434_v22 = vmul.f32 %v909_v7, %v430_v19 }
 0x35e   :  { %914 = vrsqrt.f32 %v434_v22  ;;  %vm444_vm11 = vcmp.eq.f32.partialorder %v434_v22, inf  ;;  %v447_v24 = vand.u32 2147483648, %v434_v22  ;;  %vm446_vm12 = vcmp.eq.f32.partialorder %v434_v22, 0.0 }
 0x367   :  { %v913_v23 = vpop.eup %912 }
 0x368   :  { %v436_v25 = vmul.f32 %v913_v23, %v433_v17 }
 0x36a   :  { %v438_v28 = vsel %vm437_vm9, %v433_v17, %v436_v25 }
 0x36b   :  { %v915_v29 = vpop.eup %914  ;;  %v441_v32 = vsel %vm439_vm10, %v440_v27, %v438_v28 }
 0x36c   :  { %v443_v30 = vmul.f32 %v915_v29, %v434_v22  ;;  %916 = vrcp.f32 %v441_v32 }
 0x36e   :  { %v445_v26 = vsel %vm444_vm11, %v434_v22, %v443_v30 }
 0x36f   :  { %v448_v33 = vsel %vm446_vm12, %v447_v24, %v445_v26 }
 0x370   :  { %918 = vrcp.f32 %v448_v33 }
 0x379   :  { %v917_v35 = vpop.eup %916  ;;  %v485_v46 = vpop.trf.xlu0 }
 0x37a   :  { %v450_v39 = vmul.f32 %v917_v35, %v911_v8 }
 0x37c   :  { %v456_v40 = vrot.slane %v450_v39, %v1110_v31 }
 0x37d   :  { %v919_v36 = vpop.eup %918 }
 0x37e   :  { %v452_v37 = vmul.f32 %v919_v36, %v909_v7 }
 0x380   :  { %v463_v38 = vrot.slane %v452_v37, %v1110_v31  ;;  %v689_v31 = vld [vmem:[#allocation7 + $0x10] sm:$0xff] }
 0x382   :  { %465 = vbcast.lane.b32.xlu1 %v463_v38, 256 }
 0x386   :  { %458 = vbcast.lane.b32.xlu1 %v456_v40, 256 }
 0x3af   :  { %574 = vxpose.xlu1.b32.start.end [1/1] (short) (narrow) %v1114_v45, 8  ;;  %v688_v45 = vld [vmem:[#allocation7 + $0x8] sm:$0xff] }
 0x3f4   :  { %v466_v41 = vpop.permute.xlu1 %465 }
 0x3f5   :  { %v468_v42 = vmul.f32 %v466_v41, %v1096_v21  ;;  %v687_v21 = vld [vmem:[#allocation7] sm:$0xff] }
 0x3f7   :  { %872 = vmatpush3.msra.mxu0 %v468_v42 }
 0x3f8   :  { %v459_v43 = vpop.permute.xlu1 %458 }
 0x3f9   :  { %v467_v44 = vmul.f32 %v459_v43, %v1094_v20 }
 0x3fb   :  { %867 = vmatpush3.msra.mxu1 %v467_v44 }
 0x3fc   :  { %869 = vmatmul.mubr.msk.f32.vlgmr.msra.gmra.mxu1 %vm378_vm4, %v485_v46  ;;  %876 = vmatprep.subr.mxu1 %v690_v48 }
 0x3fd   :  { %877 = vmatpush3.msra.mxu1 %v690_v48 }
 0x3fe   :  { %878 = vmatprep.subr.mxu1 %v689_v31 }
 0x3ff   :  { %879 = vmatpush3.msra.mxu1 %v689_v31 }
 0x400   :  { %880 = vmatprep.subr.mxu1 %v688_v45 }
 0x401   :  { %881 = vmatpush3.msra.mxu1 %v688_v45 }
 0x402   :  { %882 = vmatprep.subr.mxu1 %v687_v21 }
 0x403   :  { %883 = vmatpush3.msra.mxu1 %v687_v21 }
 0x42b   :  { %v590_v47 = vpop.trf.xlu1 }
 0x42c   :  { %874 = vmatmul.mubr.msk.f32.vlgmr.msra.gmra.mxu0 %vm378_vm4, %v590_v47 }
 0x4bc   :  { %v570_v20 = vpop.f32.mrf.mxu1 }
 0x4bd   :  { %vm679_vm14 = vcmp.gt.f32.partialorder %v570_v20, 0.0  ;;  %v681_v49 = vmul.f32 0.2, %v570_v20 }
 0x4be   :  { %v870_v50 = vpop.f32.mrf.mxu1 }
 0x4bf   :  { %v683_v51 = vsel %vm679_vm14, %v570_v20, %v681_v49 }
 0x4c0   :  { %v685_v52 = vmul.f32 %v683_v51, %v459_v43 }
 0x4c2   :  { %884 = vmatprep.mubr.msk.f32.mxu1 %vm161_vm3, %v685_v52 }
 0x4ec   :  { %v675_v53 = vpop.f32.mrf.mxu0 }
 0x4ed   :  { %vm680_vm15 = vcmp.gt.f32.partialorder %v675_v53, 0.0  ;;  %v682_v54 = vmul.f32 0.2, %v675_v53 }
 0x4ee   :  { %v875_v55 = vpop.f32.mrf.mxu0 }
 0x4ef   :  { %v684_v56 = vsel %vm680_vm15, %v675_v53, %v682_v54 }
 0x4f0   :  { %v686_v57 = vmul.f32 %v684_v56, %v466_v41 }
 0x4f2   :  { %885 = vmatmul.mubr.msk.f32.vlgmr.msra.gmra.mxu1 %vm161_vm3, %v686_v57 }
 0x5b2   :  { %v886_v58 = vpop.f32.mrf.mxu1 }
 0x5b3   :  { %vm773_vm0 = vcmp.gt.f32.partialorder %v886_v58, 0.0  ;;  %v775_v59 = vmul.f32 0.2, %v886_v58 }
 0x5b4   :  { %v763_v60 = vpop.f32.mrf.mxu1 }
 0x5b5   :  { %v777_v61 = vsel %vm773_vm0, %v886_v58, %v775_v59  ;;  %vm772_vm1 = vcmp.gt.f32.partialorder %v763_v60, 0.0  ;;  %v774_v62 = vmul.f32 0.2, %v763_v60 }
 0x5b6   :  { %779 = vst.msk [vmem:[#allocation8 + $0x8] sm:$0xff] %vm161_vm3, %v777_v61 }
 0x5b7   :  { %v776_v63 = vsel %vm772_vm1, %v763_v60, %v774_v62 }
 0x5b8   :  { %778 = vst.msk [vmem:[#allocation8] sm:$0xff] %vm161_vm3, %v776_v63 }
 0x5b9   :  { %991 = shalt.err (!%p988_p5)
}
 0x5ba   :  { %791 = dma.vmem_to_hbm [thread:$0]  %s786_s29, 256, %s1147_s6, [#allocation4], %s1008_s26, %s1008_s26, %s1009_s27  }
 0x5bb   :  { %1004 = dma.done.wait [#allocation4], 256  }
 0x5bc   :  { %1005 = vsyncadd [#allocation4], 4294967040 }
 0x5bd   :  { %795 = vsyncpa [#allocation3], 1 }
 0x5be   :  { %796 = vsyncpa [#allocation6], 1 }
 0x5bf   :  { %797 = vsyncpa [#allocation4], 1 }

</bundles_post_ra>
